<compile_context>
chip_gen: v6e
topology: v6e:2x2x1
jax: 0.10.0
libtpu: 0.0.40
codegen_flags: <defaults>
</compile_context>

<pallas_src>
import jax
import jax.numpy as jnp
from jax.experimental import pallas as pl
from jax.experimental.pallas import tpu as pltpu

# Frozen module constant (requires_grad=False) baked into the kernel.
_LAPLACIAN_3x3 = ((0.0, 1.0, 0.0),
                  (1.0, -4.0, 1.0),
                  (0.0, 1.0, 0.0))


def _laplacian_kernel(x_ref, o_ref):
    # x_ref: (tb, H, W)      input planes
    # o_ref: (tb, H-2, W-2)  valid-conv output planes
    oh = o_ref.shape[1]
    ow = o_ref.shape[2]
    # Accumulate in f32 (free: the kernel is HBM-bound; matches PyTorch Conv2d
    # fp32 accumulation for low-precision inputs; a no-op cast for f32 inputs).
    x = x_ref[...].astype(jnp.float32)

    top    = x[:, 0:oh,     1:1 + ow]
    left   = x[:, 1:1 + oh, 0:ow]
    center = x[:, 1:1 + oh, 1:1 + ow]
    right  = x[:, 1:1 + oh, 2:2 + ow]
    bottom = x[:, 2:2 + oh, 1:1 + ow]

    # Center tap seeds the accumulator; the four unit-weight taps are plain adds.
    acc = (-4.0) * center
    acc = acc + top
    acc = acc + left
    acc = acc + right
    acc = acc + bottom

    o_ref[...] = acc.astype(o_ref.dtype)


def _sublane_rows(itemsize):
    # VMEM lays the last two dims out in (sublane x 128) tiles:
    # 8 rows for 4-byte dtypes, 16 for 2-byte, 32 for 1-byte.
    return max(8, 32 // max(1, itemsize))


def _padded_plane_bytes(h, w, itemsize):
    sub = _sublane_rows(itemsize)
    return pl.cdiv(h, sub) * sub * pl.cdiv(w, 128) * 128 * itemsize


def gradient_feature(x, *, block_planes=None,
                     target_block_bytes=2 * 1024 * 1024,
                     min_grid_steps=8):
    """Depthwise 3x3 Laplacian conv: x (N, C, H, W) -> (N, C, H-2, W-2)."""
    N, C, H, W = x.shape
    assert H >= 3 and W >= 3, "valid 3x3 conv needs H, W >= 3"
    B = N * C
    itemsize = jnp.dtype(x.dtype).itemsize

    # Real (tile-padded) VMEM footprint of one input plane + one output plane.
    in_plane = _padded_plane_bytes(H, W, itemsize)
    out_plane = _padded_plane_bytes(H - 2, W - 2, itemsize)
    plane_bytes = in_plane + out_plane

    if block_planes is None:
        # ~1-4 MiB of padded bytes per block ...
        tb = max(1, target_block_bytes // plane_bytes)
        # ... but keep enough grid steps to pipeline DMA against compute.
        tb = min(tb, max(1, pl.cdiv(B, min_grid_steps)))
        tb = int(min(tb, B))
        # Shrink tb so the (masked) partial tail block stays as small as possible.
        grid_b = pl.cdiv(B, tb)
        tb = pl.cdiv(B, grid_b)
    else:
        tb = int(max(1, min(block_planes, B)))
    grid_b = pl.cdiv(B, tb)   # partial last block handled by Pallas masking

    # Double-buffered input + output blocks + compiler scratch headroom,
    # capped well under v7x's 64 MiB physical VMEM.
    in_blk = tb * in_plane
    out_blk = tb * out_plane
    vmem_limit = int(min(max(2 * (in_blk + out_blk) + (4 << 20), 16 << 20), 40 << 20))

    cost = pl.CostEstimate(
        flops=6 * B * (H - 2) * (W - 2),
        transcendentals=0,
        bytes_accessed=itemsize * (B * H * W + B * (H - 2) * (W - 2)),
    )

    x3 = x.reshape(B, H, W)
    out = pl.pallas_call(
        _laplacian_kernel,
        out_shape=jax.ShapeDtypeStruct((B, H - 2, W - 2), x.dtype),
        grid_spec=pltpu.PrefetchScalarGridSpec(
            num_scalar_prefetch=0,
            grid=(grid_b,),
            in_specs=[pl.BlockSpec((tb, H, W), lambda i: (i, 0, 0))],
            out_specs=pl.BlockSpec((tb, H - 2, W - 2), lambda i: (i, 0, 0)),
        ),
        compiler_params=pltpu.CompilerParams(
            dimension_semantics=("parallel",),
            vmem_limit_bytes=vmem_limit,
        ),
        cost_estimate=cost,
    )(x3)

    return out.reshape(N, C, H - 2, W - 2)


def _reference(x):
    """Pure-JAX reference: depthwise conv with the same frozen Laplacian weight."""
    N, C, H, W = x.shape
    lap = jnp.array(_LAPLACIAN_3x3, dtype=jnp.float32).reshape(1, 1, 3, 3)
    w_full = jnp.broadcast_to(lap, (C, 1, 3, 3)).astype(x.dtype)  # OIHW, groups=C
    return jax.lax.conv_general_dilated(
        x, w_full, window_strides=(1, 1), padding="VALID",
        dimension_numbers=("NCHW", "OIHW", "NCHW"),
        feature_group_count=C)


if __name__ == "__main__":
    key = jax.random.PRNGKey(0)
    N, C, H, W = 2, 4, 16, 16
    x = jax.random.normal(key, (N, C, H, W), dtype=jnp.float32)

    # Default auto-tiled path.
    out = jax.block_until_ready(gradient_feature(x))
    ref = jax.block_until_ready(_reference(x))
    assert out.shape == (N, C, H - 2, W - 2), out.shape
    assert jnp.allclose(out, ref, atol=1e-5, rtol=1e-5), "mismatch vs reference"

    # Exercise the partial-tail-block path (B=8, tb=3 -> grid of 3 with masked tail).
    out2 = jax.block_until_ready(gradient_feature(x, block_planes=3))
    assert jnp.allclose(out2, ref, atol=1e-5, rtol=1e-5), "mismatch (blocked path)"

    # bf16 input: kernel accumulates in f32 and casts at the store.
    x_bf = x.astype(jnp.bfloat16)
    out_bf = jax.block_until_ready(gradient_feature(x_bf))
    assert out_bf.dtype == jnp.bfloat16
    assert jnp.allclose(out_bf.astype(jnp.float32), ref, atol=0.15, rtol=0.05), \
        "mismatch (bf16 path)"

    print("KERNEL_OK")
</pallas_src>

<mosaic_0001>
module attributes {stable_mosaic.version = 11 : i64} {
  func.func @_laplacian_kernel(%arg0: i32, %arg1: memref<1x16x16xf32, #tpu.memory_space<vmem>>, %arg2: memref<1x14x14xf32, #tpu.memory_space<vmem>>) attributes {dimension_semantics = [#tpu.dimension_semantics<parallel>], iteration_bounds = array<i64: 8>, scalar_prefetch = 0 : i64, scratch_operands = 0 : i64, tpu.core_type = #tpu.core_type<tc>, window_params = [{transform_indices = @transform_0, window_bounds = array<i64: 1, 16, 16>}, {transform_indices = @transform_1, window_bounds = array<i64: 1, 14, 14>}]} {
    %c0 = arith.constant 0 : index
    %c0_0 = arith.constant 0 : index
    %c0_1 = arith.constant 0 : index
    %0 = vector.load %arg1[%c0, %c0_0, %c0_1] : memref<1x16x16xf32, #tpu.memory_space<vmem>>, vector<1x16x16xf32>
    %1 = vector.extract_strided_slice %0 {offsets = [0, 0, 1], sizes = [1, 14, 14], strides = [1, 1, 1]} : vector<1x16x16xf32> to vector<1x14x14xf32>
    %2 = vector.extract_strided_slice %0 {offsets = [0, 1, 0], sizes = [1, 14, 14], strides = [1, 1, 1]} : vector<1x16x16xf32> to vector<1x14x14xf32>
    %3 = vector.extract_strided_slice %0 {offsets = [0, 1, 1], sizes = [1, 14, 14], strides = [1, 1, 1]} : vector<1x16x16xf32> to vector<1x14x14xf32>
    %4 = vector.extract_strided_slice %0 {offsets = [0, 1, 2], sizes = [1, 14, 14], strides = [1, 1, 1]} : vector<1x16x16xf32> to vector<1x14x14xf32>
    %5 = vector.extract_strided_slice %0 {offsets = [0, 2, 1], sizes = [1, 14, 14], strides = [1, 1, 1]} : vector<1x16x16xf32> to vector<1x14x14xf32>
    %cst = arith.constant -4.000000e+00 : f32
    %6 = vector.broadcast %cst : f32 to vector<1x14x14xf32>
    %7 = arith.mulf %6, %3 : vector<1x14x14xf32>
    %8 = arith.addf %7, %1 : vector<1x14x14xf32>
    %9 = arith.addf %8, %2 : vector<1x14x14xf32>
    %10 = arith.addf %9, %4 : vector<1x14x14xf32>
    %11 = arith.addf %10, %5 : vector<1x14x14xf32>
    %c0_2 = arith.constant 0 : index
    %c0_3 = arith.constant 0 : index
    %c0_4 = arith.constant 0 : index
    %12 = vector.load %arg2[%c0_2, %c0_3, %c0_4] : memref<1x14x14xf32, #tpu.memory_space<vmem>>, vector<1x14x14xf32>
    tpu.vector_store %arg2[%c0_2, %c0_3, %c0_4], %11 {strides = array<i32>} : memref<1x14x14xf32, #tpu.memory_space<vmem>>, vector<1x14x14xf32>,
    return
  }
  func.func @transform_0(%arg0: i32) -> (i32, i32, i32) {
    %c0_i32 = arith.constant 0 : i32
    %c0_i32_0 = arith.constant 0 : i32
    %c0_i32_1 = arith.constant 0 : i32
    return %arg0, %c0_i32, %c0_i32_0 : i32, i32, i32
  }
  func.func @transform_1(%arg0: i32) -> (i32, i32, i32) {
    %c0_i32 = arith.constant 0 : i32
    %c0_i32_0 = arith.constant 0 : i32
    %c0_i32_1 = arith.constant 0 : i32
    return %arg0, %c0_i32, %c0_i32_0 : i32, i32, i32
  }
}

</mosaic_0001>

<bundles_post_ra>
// kernel: tpu_custom_call.1
= control target key start
LH: loop header
LB: loop body
LE: loop exit
PB: predicated region body
PF: predicated region fallthrough
CT: control target
= control target key end

     0   :  { %6 = vsyncpa [#allocation3], 0  ;;  %s491_s0 = inlined_call_operand.hbm [shape: f32[8,16,16], index: 0, kind: input, shape index: {}]   ;;  %s492_s1 = inlined_call_operand.vmem [shape: f32[8,14,14], index: 1, kind: output, shape index: {}]  }
   0x1   :  { %8 = vsyncpa [#allocation3 + $0x1], 0  ;;  %s390_s6 = smov 0   ;;  %s392_s7 = smov 0  }
   0x2   :  { %s394_s8 = smov 0   ;;  %s396_s9 = smov 0  }
   0x3 LB: > { %s409_s10 = sadd.s32 4294967295, %s373_s9   ;;  %s412_s11 = sadd.s32 1, %s373_s9   ;;  %s373_s9 = sphi %s396_s9, %s501_s9   ;;  %s369_s8 = sphi %s394_s8, %s500_s8   ;;  %s365_s7 = sphi %s392_s7, %s499_s7   ;;  %s361_s6 = sphi %s390_s6, %s498_s6  }
   0x4   : > { %s18_s12 = ssub.s32 %s373_s9, %s412_s11  ;;  %s21_s13 = sadd.s32 1, %s369_s8 }
   0x5   : > { %p19_p0 = scmp.eq.s32.totalorder %s18_s12, 0  ;;  %p28_p1 = scmp.ne.s32.totalorder %s369_s8, %s365_s7 }
   0x6   : > { %p29_p2 = scmp.eq.s32.totalorder %s373_s9, 0  ;;  %p34_p3 = scmp.ne.s32.totalorder %s365_s7, %s361_s6 }
   0x7   : > { %s422_s14 = scalar_select %p19_p0, %s369_s8, %s21_s13  }
   0x8   : > { %p30_p4 = por %p29_p2, %p28_p1  ;;  %p35_p5 = scmp.eq.s32.totalorder %s409_s10, 0 }
   0x9   : > { %p274_p6 = scmp.lt.s32.totalorder %s373_s9, 8  ;;  %s84_s16 = sand.u32 1, %s369_s8  }
   0xa   : > { %p426_p7 = por %p35_p5, %p34_p3  ;;  %s257_s17 = sshll.u32 %s84_s16, 4 }
   0xb   : > { %s266_s18 = sshll.u32 %s373_s9, 8  ;;  %s88_s22 = scalar_lea.vmem [#allocation2], %s257_s17 }
   0xc   : > { %s494_s15 = scalar_select %p426_p7, 1, 0 }
   0xd   : > { %s435_s21 = scalar_lea.hbm %s491_s0, %s266_s18  ;;  %s95_s23 = sshll.u32 %s88_s22, 4  ;;  %s437_s23 = int_to_ptr.vmem [resolvable:$true] %s95_s23 }
   0xe   : > { %p439_p8 = pnand %p274_p6, %p30_p4  ;;  %s444_s25 = scalar_lea.sflag [#allocation3], %s84_s16 }
   0xf   : > { %s311_s26 = scalar_lea.hbm %s435_s21, 256  ;;  %s316_s29 = scalar_lea.hbm %s491_s0, 2048 }
  0x10   : > { %p312_p10 = scmp.ne.s32.totalorder %s435_s21, %s311_s26  ;;  %p313_p11 = pneg %p439_p8 }
  0x11   : > { %p317_p0 = scmp.lt.s32.totalorder %s435_s21, %s491_s0  ;;  %p318_p1 = scmp.lt.s32.totalorder %s316_s29, %s311_s26 }
  0x12   : > { %p314_p12 = pnand %p313_p11, %p312_p10 }
  0x13   : > { %p319_p2 = por %p318_p1, %p317_p0 }
  0x14   : > { %p315_p13 = pneg %p314_p12 }
  0x16   : > { %p320_p3 = pnand %p319_p2, %p315_p13 }
  0x18   : > { %323 = shalt.err (!%p320_p3)
}
  0x19   : > { %s324_s3 = scalar_lea.vmem %s437_s23, 256  ;;  %s375_s4 = smov [#allocation2]  }
  0x1a   : > { %p325_p4 = scmp.ne.s32.totalorder %s437_s23, %s324_s3  ;;  %s329_s5 = sshll.u32 %s375_s4, 4  ;;  %s330_s5 = int_to_ptr.vmem [resolvable:$false] %s329_s5 }
  0x1b   : > { %s331_s6 = scalar_lea.vmem %s330_s5, 512  ;;  %p332_p10 = scmp.lt.s32.totalorder %s437_s23, %s330_s5 }
  0x1c   : > { %p327_p5 = pnand %p325_p4, %p313_p11  ;;  %p333_p12 = scmp.lt.s32.totalorder %s331_s6, %s324_s3 }
  0x1e   : > { %p328_p6 = pneg %p327_p5  ;;  %p334_p9 = por %p333_p12, %p332_p10 }
  0x20   : > { %p335_p7 = pnand %p334_p9, %p328_p6 }
  0x22   : > { %338 = shalt.err (!%p335_p7)
}
  0x23   : > { %s376_s12 = smov 128   ;;  %s377_s13 = smov 8  }
  0x24   : > { %273 = dma.hbm_to_vmem [thread:$0]  (!%p439_p8), %s435_s21, 256, %s437_s23, %s444_s25, %s376_s12, %s376_s12, %s377_s13  }
  0x25   : > { %p103_p11 = scmp.lt.s32.totalorder %s373_s9, 9  ;;  %p496_p13 = scmp.ge.s32.totalorder %s373_s9, 1 }
  0x27   : > { %p104_p0 = pnand %p496_p13, %p103_p11 }
  0x28   : > { %s109_s16 = sand.u32 (!%p104_p0), 1, %s365_s7   ;;  %p497_p7 = scmp.ne.s32.totalorder (!%p104_p0), %s494_s15, 0 }
  0x29   : > { %107 = sbr.rel (%p104_p0) target bundleno = 289 (0x121), region = 24  ;;  %s261_s17 = sshll.u32 (!%p104_p0), %s109_s16, 4 }
  0x2a   : > { %s110_s18 = scalar_lea.sflag (!%p104_p0), [#allocation3], %s109_s16  ;;  %s113_s19 = scalar_lea.vmem (!%p104_p0), [#allocation2], %s261_s17 }
  0x2e   : > { %356 = dma.done.wait (%p497_p7), %s110_s18, 256  }
  0x2f   : > { %358 = vsyncadd (%p497_p7), %s110_s18, 4294967040  ;;  %v137_v0 = vld [vmem:[%s113_s19] sm:$0xff]  ;;  %v138_v1 = vld [vmem:[%s113_s19 + $0x8] sm:$0xff]  ;;  %vm167_vm0 = vcmask 1046528   ;;  %s378_s20 = smov 1   ;;  %s379_s21 = smov 127  }
  0x30   : > { %151 = vrot.lane.b32.xlu0 %v137_v0, %s378_s20  ;;  %159 = vrot.lane.b32.xlu1 %v137_v0, %s379_s21  ;;  %v169_v2 = vrot.slane %v138_v1, 1  ;;  %v168_v3 = vrot.slane %v137_v0, 1  ;;  %vm143_vm1 = vcmask 1040384   ;;  %v144_v4 = vrot.slane %v137_v0, 7  ;;  %p132_p8 = scmp.lt.s32.totalorder %s409_s10, 7 }
  0x31   : > { %v140_v5 = vmul.f32 -4.0, %v138_v1  ;;  %v145_v6 = vrot.slane %v138_v1, 7  ;;  %v139_v10 = vmul.f32 -4.0, %v137_v0  ;;  %vm183_vm2 = vcmask 113665  }
  0x32   : > { %v170_v7 = vsel %vm167_vm0, %v168_v3, %v169_v2  ;;  %s503_s10 = smov (!%p132_p8, %s409_s10), 7  ;;  %vm185_vm3 = vcmask 112640  }
  0x33   : > { %v146_v8 = vsel %vm143_vm1, %v144_v4, %v145_v6  ;;  %v149_v11 = vadd.f32 %v144_v4, %v139_v10  ;;  %s267_s9 = sshll.u32 %s503_s10, 4 }
  0x34   : > { %153 = vrot.lane.b32.xlu0 %v138_v1, %s378_s20  ;;  %161 = vrot.lane.b32.xlu1 %v138_v1, %s379_s21  ;;  %v150_v9 = vadd.f32 %v146_v8, %v140_v5  ;;  %s136_s23 = scalar_lea.vmem %s492_s1, %s267_s9 }
  0xa2   : > { %v152_v12 = vpop.permute.xlu0 %151  ;;  %v160_v13 = vpop.permute.xlu1 %159 }
  0xa3   : > { %v157_v14 = vadd.f32 %v152_v12, %v149_v11 }
  0xa5   : > { %v165_v15 = vadd.f32 %v160_v13, %v157_v14 }
  0xa6   : > { %v154_v16 = vpop.permute.xlu0 %153  ;;  %v162_v17 = vpop.permute.xlu1 %161 }
  0xa7   : > { %v173_v18 = vadd.f32 %v170_v7, %v165_v15  ;;  %v158_v19 = vadd.f32 %v154_v16, %v150_v9 }
  0xa9   : > { %v166_v20 = vadd.f32 %v162_v17, %v158_v19  ;;  %177 = vrot.lane.b32.xlu0 %v173_v18, %s379_s21 }
  0xab   : > { %v174_v21 = vadd.f32 %v169_v2, %v166_v20 }
  0xad   : > { %179 = vrot.lane.b32.xlu1 %v174_v21, %s379_s21 }
 0x11b   : > { %v178_v22 = vpop.permute.xlu0 %177 }
 0x11c   : > { %184 = vst.msk [vmem:[%s136_s23 - $0x1] sm:$0xfe] %vm183_vm2, %v178_v22 }
 0x11f   : > { %v180_v23 = vpop.permute.xlu1 %179 }
 0x120   : > { %186 = vst.msk [vmem:[%s136_s23 + $0x7] sm:$0x7f] %vm185_vm3, %v180_v23 }
 0x121 PF: > { %p11_p9 = scmp.ge.s32.totalorder %s412_s11, 10   ;;  %s498_s6 = smov %s365_s7 }
 0x122   : > { %s499_s7 = smov %s369_s8  ;;  %s500_s8 = smov %s422_s14 }
 0x123   : > { %s501_s9 = smov %s412_s11  ;;  %13 = sbr.rel (!%p11_p9) target bundleno = 3 (0x3), region = 64 }
 0x128   :  { %208 = vsyncpa [#allocation3], 1 }
 0x129   :  { %210 = vsyncpa [#allocation3 + $0x1], 1 }

</bundles_post_ra>
